<compile_context>
chip_gen: v5e
topology: v5e:2x2
jax: 0.10.0
libtpu: 0.0.40
codegen_flags: <defaults>
</compile_context>

<pallas_src>
import functools

import jax
import jax.numpy as jnp
from jax import lax
from jax.experimental import pallas as pl
from jax.experimental.pallas import tpu as pltpu


# --------------------------------------------------------------------------
# Kernels
# --------------------------------------------------------------------------


def _project_normalize(pooled, w_ref, b_ref, out_ref):
    """pooled [tb, H] f32 -> Linear (weight [D, H], bias [1, D]) -> L2 norm."""
    # x @ W.T without any explicit transpose: contract H (dim 1 of both).
    # HIGHEST keeps the tiny projection at full f32 MXU precision (costs ~0).
    emb = lax.dot_general(
        pooled, w_ref[...],
        dimension_numbers=(((1,), (1,)), ((), ())),
        preferred_element_type=jnp.float32,
        precision=lax.Precision.HIGHEST,
    ) + b_ref[...]                                          # [tb, D]
    # F.normalize(dim=-1, eps=1e-12): x / max(||x||, 1e-12) == x * rsqrt(...)
    inv_norm = lax.rsqrt(
        jnp.maximum(jnp.sum(emb * emb, axis=-1, keepdims=True), 1e-24))
    out_ref[...] = (emb * inv_norm).astype(out_ref.dtype)


def text_pool_proj_kernel(hid_ref, mask_ref, cnt_ref, w_ref, b_ref,
                          out_ref, sum_acc):
    """Masked mean-pool over seq, then project + L2-normalize.

    grid = (B // tb, S // ts); seq is the last ('arbitrary') reduction axis;
    out_ref maps to the same (i, 0) block across it (accumulator pattern).
    """
    j = pl.program_id(1)

    @pl.when(j == 0)
    def _():
        sum_acc[...] = jnp.zeros_like(sum_acc)

    h = hid_ref[...]                          # [tb, ts, H] encoder dtype (bf16)
    m = mask_ref[...]                         # [tb, ts, 1] same dtype, 0/1
    # Mask in the native dtype (exact for a 0/1 mask, matches torch's
    # `hidden * mask.type_as(hidden)`), then a single upcast into the f32
    # accumulation: one VALU mul + cast per element instead of cast+mul+add.
    sum_acc[...] += jnp.sum((h * m).astype(jnp.float32), axis=1)   # [tb, H]

    @pl.when(j == pl.num_programs(1) - 1)
    def _():
        # counts are precomputed (and clamped) outside the hot loop.
        pooled = sum_acc[...] * pl.reciprocal(cnt_ref[...])        # [tb, H]
        _project_normalize(pooled, w_ref, b_ref, out_ref)


def vision_pool_proj_kernel(hid_ref, w_ref, b_ref, out_ref, sum_acc, *,
                            inv_num_patches):
    """Mean-pool over patches, then project + L2-normalize."""
    j = pl.program_id(1)

    @pl.when(j == 0)
    def _():
        sum_acc[...] = jnp.zeros_like(sum_acc)

    sum_acc[...] += jnp.sum(hid_ref[...].astype(jnp.float32), axis=1)

    @pl.when(j == pl.num_programs(1) - 1)
    def _():
        pooled = sum_acc[...] * inv_num_patches                    # [tb, H]
        _project_normalize(pooled, w_ref, b_ref, out_ref)


# --------------------------------------------------------------------------
# Tile selection & VMEM budgeting
# --------------------------------------------------------------------------


def _divisor_tile(dim, target, multiple):
    """Largest divisor of `dim` that is <= target and a multiple of
    `multiple`, or None if there is none."""
    for t in range(min(target, dim), 0, -1):
        if dim % t == 0 and t % multiple == 0:
            return t
    return None


def _choose_tiles(B, S, H, elem_bytes, batch_tile, seq_tile, block_bytes):
    """VMEM-aware tile selection.

    Bounds the streamed (tb, ts, H) block by bytes (~2-8 MiB/buffer already
    reaches ~85% of HBM roofline), keeps >= 2 batch tiles when B >= 16 so the
    'parallel' grid axis shards across v7x's two TensorCores, prefers
    multiple-of-16 seq tiles (bf16 sublane packing), and only returns exact
    divisors so no rows/tokens are silently dropped.
    """
    tb_cap = B if batch_tile is None else max(1, min(batch_tile, B))
    ts_cap = S if seq_tile is None else max(1, min(seq_tile, S))
    if B >= 16:
        tb_cap = min(tb_cap, B // 2)           # >= 2 batch tiles (megacore)

    def legal_tb(cap):
        # (tb, 1) / (tb, D) blocks need tb % 8 == 0 or tb == B.
        return _divisor_tile(B, cap, 8) or B

    def legal_ts(cap):
        # (ts, H) / (ts, 1) blocks need ts % 8 == 0 or ts == S.
        return _divisor_tile(S, cap, 16) or _divisor_tile(S, cap, 8) or S

    row_bytes = H * elem_bytes
    tb = legal_tb(min(tb_cap,
                      max(1, block_bytes // max(1, min(S, 16) * row_bytes))))
    ts = legal_ts(min(ts_cap, max(1, block_bytes // max(1, tb * row_bytes))))
    if tb * ts * row_bytes > block_bytes:
        # ts was forced to full S (no 8-divisible divisor): shrink tb instead.
        tb = legal_tb(min(tb, max(1, block_bytes // max(1, ts * row_bytes))))
    return tb, ts


def _vmem_cap_bytes():
    """~85% of physical VMEM (fits 64 MiB v7x and 128 MiB v5e/v6e), with a
    v7x-safe fallback if the trace-time query is unavailable."""
    try:
        return int(0.85 * pltpu.get_tpu_info().vmem_capacity_bytes)
    except Exception:
        return 56 * 1024 * 1024


def _vmem_limit_bytes(*resident_bytes):
    """Honest per-call residency (inputs/outputs double-buffered, scratch
    single-buffered) plus headroom for compiler-internal scratch, clamped to
    ~85% of the current generation's physical VMEM."""
    need = int(sum(resident_bytes)) + (8 << 20)
    return int(min(max(need, 32 << 20), _vmem_cap_bytes()))


# --------------------------------------------------------------------------
# Wrapper
# --------------------------------------------------------------------------


def clip_forward(text_hidden, attention_mask, vision_hidden,
                 text_w, text_b, img_w, img_b, logit_scale,
                 *, batch_tile=None, seq_tile=None,
                 block_bytes=4 * 1024 * 1024):
    """Mirrors CLIP.forward: returns (image_embeds, text_embeds, logit_scale).

    text_hidden:    [B, S, Ht]  text encoder last_hidden_state (bf16 ok)
    attention_mask: [B, S]      text attention mask (0/1)
    vision_hidden:  [B, P, Hv]  vision encoder last_hidden_state (bf16 ok)
    text_w / img_w: [D, H]      nn.Linear weights (PyTorch [out, in] layout)
    text_b / img_b: [D]         nn.Linear biases
    """
    B, S, Ht = text_hidden.shape
    Bv, P, Hv = vision_hidden.shape
    assert Bv == B
    D = text_w.shape[0]
    f32 = jnp.float32

    t_elem = jnp.dtype(text_hidden.dtype).itemsize
    v_elem = jnp.dtype(vision_hidden.dtype).itemsize
    tb_t, ts = _choose_tiles(B, S, Ht, t_elem, batch_tile, seq_tile, block_bytes)
    tb_v, tp = _choose_tiles(B, P, Hv, v_elem, batch_tile, seq_tile, block_bytes)
    assert B % tb_t == 0 and S % ts == 0, (tb_t, ts)
    assert B % tb_v == 0 and P % tp == 0, (tb_v, tp)

    # Tiny host-side prep (O(B*S), negligible vs streaming the hidden states):
    #  - mask as [B, S, 1] in the hidden dtype -> in-kernel it sits
    #    (sublane=ts, lane=1) and lane-splats against the (sublane=ts, lane=H)
    #    hidden tile; no lane->sublane relayout per streamed block,
    #  - per-row token counts, pre-clamped, as a [B, 1] f32 VMEM input.
    mask3 = attention_mask.astype(text_hidden.dtype).reshape(B, S, 1)
    counts = jnp.maximum(
        jnp.sum(attention_mask.astype(f32), axis=1, keepdims=True), 1e-6)

    text_w = text_w.astype(f32)
    img_w = img_w.astype(f32)
    text_b2 = text_b.reshape(1, D).astype(f32)
    img_b2 = img_b.reshape(1, D).astype(f32)

    # ---- text: masked mean-pool -> Linear -> L2 normalize -----------------
    # TODO(synk): if tiles ever get small (<1 MiB) consider
    # pipeline_mode=pl.Buffered(3) on the hidden spec / Buffered(1) on the
    # constant-index weight; left at default depth 2 here.
    vmem_text = _vmem_limit_bytes(
        2 * tb_t * ts * Ht * t_elem,      # streamed hidden (double-buffered)
        2 * tb_t * ts * t_elem,           # mask block
        2 * tb_t * 4,                     # counts
        2 * D * Ht * 4,                   # projection weight (const-index, still 2x)
        2 * D * 4,                        # bias
        2 * tb_t * D * 4,                 # output block
        tb_t * Ht * 4,                    # f32 accumulator scratch
    )
    text_embeds = pl.pallas_call(
        text_pool_proj_kernel,
        out_shape=jax.ShapeDtypeStruct((B, D), f32),
        grid=(B // tb_t, S // ts),
        in_specs=[
            pl.BlockSpec((tb_t, ts, Ht), lambda i, j: (i, j, 0)),  # hidden
            pl.BlockSpec((tb_t, ts, 1), lambda i, j: (i, j, 0)),   # mask
            pl.BlockSpec((tb_t, 1), lambda i, j: (i, 0)),          # counts
            pl.BlockSpec((D, Ht), lambda i, j: (0, 0)),            # weight
            pl.BlockSpec((1, D), lambda i, j: (0, 0)),             # bias
        ],
        out_specs=pl.BlockSpec((tb_t, D), lambda i, j: (i, 0)),
        scratch_shapes=[pltpu.VMEM((tb_t, Ht), f32)],
        compiler_params=pltpu.CompilerParams(
            dimension_semantics=("parallel", "arbitrary"),
            vmem_limit_bytes=vmem_text),
    )(text_hidden, mask3, counts, text_w, text_b2)

    # ---- vision: mean-pool -> Linear -> L2 normalize -----------------------
    vmem_vis = _vmem_limit_bytes(
        2 * tb_v * tp * Hv * v_elem,
        2 * D * Hv * 4,
        2 * D * 4,
        2 * tb_v * D * 4,
        tb_v * Hv * 4,
    )
    vision_kernel = functools.partial(
        vision_pool_proj_kernel, inv_num_patches=float(1.0 / P))
    image_embeds = pl.pallas_call(
        vision_kernel,
        out_shape=jax.ShapeDtypeStruct((B, D), f32),
        grid=(B // tb_v, P // tp),
        in_specs=[
            pl.BlockSpec((tb_v, tp, Hv), lambda i, j: (i, j, 0)),  # hidden
            pl.BlockSpec((D, Hv), lambda i, j: (0, 0)),            # weight
            pl.BlockSpec((1, D), lambda i, j: (0, 0)),             # bias
        ],
        out_specs=pl.BlockSpec((tb_v, D), lambda i, j: (i, 0)),
        scratch_shapes=[pltpu.VMEM((tb_v, Hv), f32)],
        compiler_params=pltpu.CompilerParams(
            dimension_semantics=("parallel", "arbitrary"),
            vmem_limit_bytes=vmem_vis),
    )(vision_hidden, img_w, img_b2)

    # forward() returns the raw logit_scale parameter; logits_per_image is an
    # unused intermediate in the reference module, so it is not computed here.
    return image_embeds, text_embeds, logit_scale


# --------------------------------------------------------------------------
# Pure-JAX reference (mirrors the PyTorch module's math, in f32)
# --------------------------------------------------------------------------


def _reference(text_hidden, attention_mask, vision_hidden,
               text_w, text_b, img_w, img_b):
    hp = lax.Precision.HIGHEST
    th = text_hidden.astype(jnp.float32)
    vh = vision_hidden.astype(jnp.float32)
    mask = attention_mask.astype(jnp.float32)[:, :, None]
    summed = jnp.sum(th * mask, axis=1)
    counts = jnp.maximum(jnp.sum(mask, axis=1), 1e-6)
    text_pooled = summed / counts
    txt_e = jnp.matmul(text_pooled, text_w.T, precision=hp) + text_b
    txt_e = txt_e / jnp.maximum(
        jnp.linalg.norm(txt_e, axis=-1, keepdims=True), 1e-12)
    img_pooled = jnp.mean(vh, axis=1)
    img_e = jnp.matmul(img_pooled, img_w.T, precision=hp) + img_b
    img_e = img_e / jnp.maximum(
        jnp.linalg.norm(img_e, axis=-1, keepdims=True), 1e-12)
    return img_e, txt_e


if __name__ == "__main__":
    # Small synthetic shapes consistent with the module's forward, sized so
    # both grid axes (batch tiles x seq tiles) are actually exercised.
    B, S, P = 16, 16, 32       # batch, text seq len, number of vision patches
    Ht, Hv = 128, 128          # text / vision hidden sizes (lane-aligned)
    D = 256                    # proj_dim (module default), lane-dense

    key = jax.random.PRNGKey(0)
    k1, k2, k3, k4, k5, k6 = jax.random.split(key, 6)

    # Encoder outputs streamed in their native bf16 (no wrapper upcast).
    text_hidden = jax.random.normal(k1, (B, S, Ht), dtype=jnp.float32).astype(
        jnp.bfloat16)
    vision_hidden = jax.random.normal(k2, (B, P, Hv), dtype=jnp.float32).astype(
        jnp.bfloat16)

    # Deterministic padding mask with varying valid lengths per row.
    lengths = (jnp.arange(B) % S) + 1
    attention_mask = (jnp.arange(S)[None, :] < lengths[:, None]).astype(jnp.int32)

    # Projection parameters (PyTorch Linear convention: weight [out, in]).
    text_w = jax.random.normal(k3, (D, Ht), dtype=jnp.float32) * 0.05
    text_b = jax.random.normal(k4, (D,), dtype=jnp.float32) * 0.05
    img_w = jax.random.normal(k5, (D, Hv), dtype=jnp.float32) * 0.05
    img_b = jax.random.normal(k6, (D,), dtype=jnp.float32) * 0.05
    logit_scale = jnp.float32(2.659)   # nn.Parameter(torch.tensor(2.659))

    # Explicit small tile caps so the multi-step grid path is exercised; the
    # byte budget still applies on top of them.
    img_e, txt_e, ls = clip_forward(
        text_hidden, attention_mask, vision_hidden,
        text_w, text_b, img_w, img_b, logit_scale,
        batch_tile=8, seq_tile=8)
    jax.block_until_ready((img_e, txt_e, ls))

    ref_img, ref_txt = _reference(
        text_hidden, attention_mask, vision_hidden,
        text_w, text_b, img_w, img_b)

    assert img_e.shape == (B, D) and txt_e.shape == (B, D)
    assert jnp.allclose(img_e, ref_img, rtol=1e-5, atol=3e-5), (
        "image embeds max err", float(jnp.max(jnp.abs(img_e - ref_img))))
    assert jnp.allclose(txt_e, ref_txt, rtol=1e-5, atol=3e-5), (
        "text embeds max err", float(jnp.max(jnp.abs(txt_e - ref_txt))))
    assert float(ls) == float(logit_scale)

    print("KERNEL_OK")
</pallas_src>

<mosaic_0001>
module attributes {stable_mosaic.version = 11 : i64} {
  func.func @text_pool_proj_kernel(%arg0: i32, %arg1: i32, %arg2: memref<8x8x128xbf16, #tpu.memory_space<vmem>>, %arg3: memref<8x8x1xbf16, #tpu.memory_space<vmem>>, %arg4: memref<8x1xf32, #tpu.memory_space<vmem>>, %arg5: memref<256x128xf32, #tpu.memory_space<vmem>>, %arg6: memref<1x256xf32, #tpu.memory_space<vmem>>, %arg7: memref<8x256xf32, #tpu.memory_space<vmem>>, %arg8: memref<8x128xf32, #tpu.memory_space<vmem>>) attributes {dimension_semantics = [#tpu.dimension_semantics<parallel>, #tpu.dimension_semantics<arbitrary>], iteration_bounds = array<i64: 2, 2>, scalar_prefetch = 0 : i64, scratch_operands = 1 : i64, tpu.core_type = #tpu.core_type<tc>, window_params = [{transform_indices = @transform_0, window_bounds = array<i64: 8, 8, 128>}, {transform_indices = @transform_1, window_bounds = array<i64: 8, 8, 1>}, {transform_indices = @transform_2, window_bounds = array<i64: 8, 1>}, {pipeline_mode = #tpu.pipeline_mode<synchronous>, transform_indices = @transform_3, window_bounds = array<i64: 256, 128>}, {pipeline_mode = #tpu.pipeline_mode<synchronous>, transform_indices = @transform_4, window_bounds = array<i64: 1, 256>}, {transform_indices = @transform_5, window_bounds = array<i64: 8, 256>}]} {
    %c0_i32 = arith.constant 0 : i32
    %0 = arith.cmpi eq, %arg1, %c0_i32 : i32
    %1 = arith.extui %0 : i1 to i32
    %c0_i32_0 = arith.constant 0 : i32
    %2 = arith.cmpi ne, %1, %c0_i32_0 : i32
    scf.if %2 {
      %cst_11 = arith.constant 0.000000e+00 : f32
      %15 = vector.broadcast %cst_11 : f32 to vector<8x128xf32>
      %c0_12 = arith.constant 0 : index
      %c0_13 = arith.constant 0 : index
      %16 = vector.load %arg8[%c0_12, %c0_13] : memref<8x128xf32, #tpu.memory_space<vmem>>, vector<8x128xf32>
      tpu.vector_store %arg8[%c0_12, %c0_13], %15 {strides = array<i32>} : memref<8x128xf32, #tpu.memory_space<vmem>>, vector<8x128xf32>,
    } else {
    }
    %c0 = arith.constant 0 : index
    %c0_1 = arith.constant 0 : index
    %c0_2 = arith.constant 0 : index
    %3 = vector.load %arg2[%c0, %c0_1, %c0_2] : memref<8x8x128xbf16, #tpu.memory_space<vmem>>, vector<8x8x128xbf16>
    %c0_3 = arith.constant 0 : index
    %c0_4 = arith.constant 0 : index
    %c0_5 = arith.constant 0 : index
    %4 = vector.load %arg3[%c0_3, %c0_4, %c0_5] : memref<8x8x1xbf16, #tpu.memory_space<vmem>>, vector<8x8x1xbf16>
    %c0_6 = arith.constant 0 : index
    %c0_7 = arith.constant 0 : index
    %5 = vector.load %arg8[%c0_6, %c0_7] : memref<8x128xf32, #tpu.memory_space<vmem>>, vector<8x128xf32>
    %6 = vector.broadcast %4 : vector<8x8x1xbf16> to vector<8x8x128xbf16>
    %7 = arith.mulf %3, %6 : vector<8x8x128xbf16>
    %8 = arith.extf %7 : vector<8x8x128xbf16> to vector<8x8x128xf32>
    %cst = arith.constant dense<0.000000e+00> : vector<8x128xf32>
    %9 = vector.multi_reduction <add>, %8, %cst [1] : vector<8x8x128xf32> to vector<8x128xf32>
    %10 = arith.addf %5, %9 : vector<8x128xf32>
    %c0_8 = arith.constant 0 : index
    %c0_9 = arith.constant 0 : index
    %11 = vector.load %arg8[%c0_8, %c0_9] : memref<8x128xf32, #tpu.memory_space<vmem>>, vector<8x128xf32>
    tpu.vector_store %arg8[%c0_8, %c0_9], %10 {strides = array<i32>} : memref<8x128xf32, #tpu.memory_space<vmem>>, vector<8x128xf32>,
    %c1_i32 = arith.constant 1 : i32
    %12 = arith.cmpi eq, %arg1, %c1_i32 : i32
    %13 = arith.extui %12 : i1 to i32
    %c0_i32_10 = arith.constant 0 : i32
    %14 = arith.cmpi ne, %13, %c0_i32_10 : i32
    scf.if %14 {
      %c0_11 = arith.constant 0 : index
      %c0_12 = arith.constant 0 : index
      %15 = vector.load %arg8[%c0_11, %c0_12] : memref<8x128xf32, #tpu.memory_space<vmem>>, vector<8x128xf32>
      %c0_13 = arith.constant 0 : index
      %c0_14 = arith.constant 0 : index
      %16 = vector.load %arg4[%c0_13, %c0_14] : memref<8x1xf32, #tpu.memory_space<vmem>>, vector<8x1xf32>
      %17 = tpu.reciprocal %16 : vector<8x1xf32> -> vector<8x1xf32>
      %18 = vector.broadcast %17 : vector<8x1xf32> to vector<8x128xf32>
      %19 = arith.mulf %15, %18 : vector<8x128xf32>
      %c0_15 = arith.constant 0 : index
      %c0_16 = arith.constant 0 : index
      %20 = vector.load %arg5[%c0_15, %c0_16] : memref<256x128xf32, #tpu.memory_space<vmem>>, vector<256x128xf32>
      %cst_17 = arith.constant dense<0.000000e+00> : vector<8x256xf32>
      %21 = tpu.matmul %19, %20, %cst_17 {dimension_numbers = #tpu.dot_dimension_numbers<[1], [1], [0], [0], [0, 0, 1, 0], [], []>, precision = #tpu.contract_precision<fp32>} : vector<8x128xf32>, vector<256x128xf32>, vector<8x256xf32> -> vector<8x256xf32>
      %c0_18 = arith.constant 0 : index
      %c0_19 = arith.constant 0 : index
      %22 = vector.load %arg6[%c0_18, %c0_19] : memref<1x256xf32, #tpu.memory_space<vmem>>, vector<1x256xf32>
      %23 = vector.broadcast %22 : vector<1x256xf32> to vector<8x256xf32>
      %24 = arith.addf %21, %23 : vector<8x256xf32>
      %25 = arith.mulf %24, %24 : vector<8x256xf32>
      %cst_20 = arith.constant dense<0.000000e+00> : vector<8xf32>
      %26 = vector.multi_reduction <add>, %25, %cst_20 [1] : vector<8x256xf32> to vector<8xf32>
      %27 = vector.shape_cast %26 : vector<8xf32> to vector<8x1xf32>
      %cst_21 = arith.constant 1.000000e-24 : f32
      %28 = vector.broadcast %cst_21 : f32 to vector<8x1xf32>
      %29 = arith.maximumf %27, %28 : vector<8x1xf32>
      %30 = math.rsqrt %29 : vector<8x1xf32>
      %31 = vector.broadcast %30 : vector<8x1xf32> to vector<8x256xf32>
      %32 = arith.mulf %24, %31 : vector<8x256xf32>
      %c0_22 = arith.constant 0 : index
      %c0_23 = arith.constant 0 : index
      %33 = vector.load %arg7[%c0_22, %c0_23] : memref<8x256xf32, #tpu.memory_space<vmem>>, vector<8x256xf32>
      tpu.vector_store %arg7[%c0_22, %c0_23], %32 {strides = array<i32>} : memref<8x256xf32, #tpu.memory_space<vmem>>, vector<8x256xf32>,
    } else {
    }
    return
  }
  func.func @transform_0(%arg0: i32, %arg1: i32) -> (i32, i32, i32) {
    %c0_i32 = arith.constant 0 : i32
    %c0_i32_0 = arith.constant 0 : i32
    return %arg0, %arg1, %c0_i32 : i32, i32, i32
  }
  func.func @transform_1(%arg0: i32, %arg1: i32) -> (i32, i32, i32) {
    %c0_i32 = arith.constant 0 : i32
    %c0_i32_0 = arith.constant 0 : i32
    return %arg0, %arg1, %c0_i32 : i32, i32, i32
  }
  func.func @transform_2(%arg0: i32, %arg1: i32) -> (i32, i32) {
    %c0_i32 = arith.constant 0 : i32
    %c0_i32_0 = arith.constant 0 : i32
    return %arg0, %c0_i32 : i32, i32
  }
  func.func @transform_3(%arg0: i32, %arg1: i32) -> (i32, i32) {
    %c0_i32 = arith.constant 0 : i32
    %c0_i32_0 = arith.constant 0 : i32
    %c0_i32_1 = arith.constant 0 : i32
    return %c0_i32, %c0_i32_0 : i32, i32
  }
  func.func @transform_4(%arg0: i32, %arg1: i32) -> (i32, i32) {
    %c0_i32 = arith.constant 0 : i32
    %c0_i32_0 = arith.constant 0 : i32
    %c0_i32_1 = arith.constant 0 : i32
    return %c0_i32, %c0_i32_0 : i32, i32
  }
  func.func @transform_5(%arg0: i32, %arg1: i32) -> (i32, i32) {
    %c0_i32 = arith.constant 0 : i32
    %c0_i32_0 = arith.constant 0 : i32
    return %arg0, %c0_i32 : i32, i32
  }
}

</mosaic_0001>

<bundles_post_ra>
// kernel: tpu_custom_call.1
= control target key start
LH: loop header
LB: loop body
LE: loop exit
PB: predicated region body
PF: predicated region fallthrough
CT: control target
= control target key end

     0   :  { %s2633_s0 = inlined_call_operand.vmem [shape: bf16[16,16,128], index: 0, kind: input, shape index: {}]   ;;  %s2634_s1 = inlined_call_operand.vmem [shape: bf16[16,16,1], index: 1, kind: input, shape index: {}]   ;;  %s2635_s2 = inlined_call_operand.vmem [shape: f32[16,1], index: 2, kind: input, shape index: {}]   ;;  %s2636_s3 = inlined_call_operand.hbm [shape: f32[256,128], index: 3, kind: input, shape index: {}]   ;;  %s2637_s4 = inlined_call_operand.vmem [shape: f32[1,256], index: 4, kind: input, shape index: {}]   ;;  %s2638_s5 = inlined_call_operand.hbm [shape: f32[16,256], index: 5, kind: output, shape index: {}]  }
   0x1   :  { %2653 = sst [smem:[#allocation16_spill]] %s2636_s3 }
   0x2   :  { %10 = vsyncpa [#allocation6], 0 }
   0x3   :  { %11 = vsyncpa [#allocation7], 0 }
   0x4   :  { %13 = vsyncpa [#allocation7 + $0x1], 0  ;;  %s1898_s18 = smov 0   ;;  %s1900_s19 = smov 0  }
   0x5   :  { %s1902_s20 = smov 0   ;;  %s1904_s21 = smov 0  }
   0x6   :  { %s1906_s22 = smov 0   ;;  %s1908_s23 = smov 0  }
   0x7   :  { %s1910_s24 = smov 0   ;;  %s1912_s25 = smov 0  }
   0x8   :  { %s1914_s26 = smov 0   ;;  %s1916_s27 = smov 0  }
   0x9 LB: > { %2654 = sst [smem:[#allocation11_spill]] %s1831_s20  ;;  %s1555_s28 = sadd.s32 4294967295, %s1859_s27   ;;  %s1859_s27 = sphi %s1916_s27, %s19_s27   ;;  %s1855_s26 = sphi %s1914_s26, %s2690_s26   ;;  %s1851_s25 = sphi %s1912_s25, %s2689_s25   ;;  %s1847_s24 = sphi %s1910_s24, %s2688_s24   ;;  %s1843_s23 = sphi %s1908_s23, %s2687_s23   ;;  %s1839_s22 = sphi %s1906_s22, %s2686_s22   ;;  %s1835_s21 = sphi %s1904_s21, %s2685_s21   ;;  %s1831_s20 = sphi %s1902_s20, %s2679_s20   ;;  %s1827_s19 = sphi %s1900_s19, %s2684_s19   ;;  %s1823_s18 = sphi %s1898_s18, %s2683_s18  }
   0xa   : > { %s1556_s29 = sadd.s32 4294967294, %s1859_s27   ;;  %s28_s30 = sadd.s32 1, %s1851_s25 }
   0xb   : > { %s31_s6 = sadd.s32 1, %s1855_s26  ;;  %p29_p0 = scmp.ge.s32.totalorder %s28_s30, 2 }
   0xc   : > { %s40_s7 = sadd.s32 1, %s1839_s22  ;;  %p47_p1 = scmp.ne.s32.totalorder %s1839_s22, %s1835_s21 }
   0xd   : > { %p48_p2 = scmp.eq.s32.totalorder %s1859_s27, 0  ;;  %s2692_s30 = smov (%p29_p0, %s28_s30), 0 }
   0xe   : > { %2655 = sst [smem:[#allocation12_spill]] %s2692_s30  ;;  %s2694_s6 = smov (!%p29_p0, %s31_s6), %s1855_s26 }
   0xf   : > { %s36_s8 = ssub.s32 %s1851_s25, %s2692_s30  ;;  %p1961_p3 = por %p48_p2, %p47_p1 }
  0x10   : > { %p33_p4 = scmp.ge.s32.totalorder %s2694_s6, 2  ;;  %s162_s10 = sadd.s32 1, %s1831_s20 }
  0x11   : > { %p172_p5 = scmp.ne.s32.totalorder %s1831_s20, %s1827_s19  ;;  %p173_p6 = scmp.eq.s32.totalorder %s1555_s28, 3 }
  0x12   : > { %s2696_s6 = smov (%p33_p4, %s2694_s6), 0  ;;  %p178_p8 = scmp.ne.s32.totalorder %s1827_s19, %s1823_s18 }
  0x13   : > { %2657 = sst [smem:[#allocation13_spill]] %s2696_s6  ;;  %p1970_p7 = por %p173_p6, %p172_p5 }
  0x14   : > { %s35_s12 = ssub.s32 %s1855_s26, %s2696_s6  ;;  %p179_p9 = scmp.eq.s32.totalorder %s1556_s29, 3 }
  0x15   : > { %s37_s13 = sor.u32 %s36_s8, %s35_s12  ;;  %p160_p10 = scmp.eq.s32.totalorder %s35_s12, 0 }
  0x16   : > { %p38_p11 = scmp.eq.s32.totalorder %s37_s13, 0  ;;  %p1978_p12 = por %p179_p9, %p178_p8 }
  0x17   : > { %s1983_s15 = scalar_select %p160_p10, %s1831_s20, %s162_s10  }
  0x18   : > { %s1986_s16 = scalar_select %p38_p11, %s1839_s22, %s40_s7  }
  0x19   : > { %2660 = sst [smem:[#allocation14_spill]] %s1983_s15  ;;  %p1557_p13 = scmp.ge.s32.totalorder %s1859_s27, 1 }
  0x1a   : > { %2661 = sst [smem:[#allocation15_spill]] %s1986_s16  ;;  %p186_p0 = scmp.lt.s32.totalorder %s1859_s27, 5 }
  0x1b   : > { %p1990_p1 = scmp.eq.s32.totalorder %s1555_s28, 0  ;;  %s2664_s3 = sld [smem:[#allocation16_spill]] }
  0x1c   : > { %p1994_p2 = pnand %p1557_p13, %p186_p0  ;;  %s1861_s7 = smov [#allocation5]  }
  0x1d   : > { %s199_s10 = sshll.u32 %s1861_s7, 4  ;;  %s1862_s28 = smov 128   ;;  %s200_s10 = int_to_ptr.vmem [resolvable:$true] %s199_s10 }
  0x1e   : > { %p1609_p4 = pneg %p1994_p2  ;;  %s1863_s6 = smov 8  }
  0x1f   : > { %p1559_p6 = scmp.ge.s32.totalorder %s1859_s27, 4 }
  0x20   : > { %p1610_p5 = pnand %p1990_p1, %p1609_p4 }
  0x21   : > { %s197_s13 = sshll.u32 %s2664_s3, 4  ;;  %212 = sbr.rel (%p1559_p6) target bundleno = 66 (0x42), region = 24  ;;  %s198_s13 = int_to_ptr.hbm [resolvable:$true] %s197_s13 }
  0x22   : > { %1612 = dma.hbm_to_vmem [thread:$0]  (!%p1610_p5), %s198_s13, 4096, %s200_s10, [#allocation6], %s1862_s28, %s1862_s28, %s1863_s6  }
  0x26   : > { %215 = sbr.rel (!%p1961_p3) target bundleno = 52 (0x34), region = 28  ;;  %s217_s8 = sand.u32 (%p1961_p3), 1, %s1839_s22  }
  0x27   : > { %s1581_s12 = sshll.u32 (%p1961_p3), %s1855_s26, 4  ;;  %s1560_s3 = sshll.u32 (%p1961_p3), %s217_s8, 5 }
  0x28   : > { %s222_s30 = sadd.s32 (%p1961_p3), %s1851_s25, %s1581_s12  ;;  %s219_s6 = scalar_lea.vmem (%p1961_p3), [#allocation3], %s1560_s3 }
  0x29   : > { %s1563_s7 = sshll.u32 (%p1961_p3), %s222_s30, 2 }
  0x2a   : > { %s224_s20 = scalar_lea.vmem (%p1961_p3), %s2633_s0, %s1563_s7 }
  0x2b   : > { %v241_v0 = vld [vmem:[%s224_s20] sm:$0xf]  ;;  %v243_v1 = vld [vmem:[%s224_s20 + $0x8] sm:$0xf]  ;;  %v245_v2 = vld [vmem:[%s224_s20 + $0x10] sm:$0xf] }
  0x2c   : > { %242 = vst [vmem:[%s219_s6] sm:$0xf] %v241_v0  ;;  %v247_v3 = vld [vmem:[%s224_s20 + $0x18] sm:$0xf]  ;;  %v249_v4 = vld [vmem:[%s224_s20 + $0x20] sm:$0xf] }
  0x2d   : > { %244 = vst [vmem:[%s219_s6 + $0x4] sm:$0xf] %v243_v1  ;;  %v251_v5 = vld [vmem:[%s224_s20 + $0x28] sm:$0xf]  ;;  %v253_v6 = vld [vmem:[%s224_s20 + $0x30] sm:$0xf] }
  0x2e   : > { %246 = vst [vmem:[%s219_s6 + $0x8] sm:$0xf] %v245_v2  ;;  %v255_v7 = vld [vmem:[%s224_s20 + $0x38] sm:$0xf] }
  0x2f   : > { %248 = vst [vmem:[%s219_s6 + $0xc] sm:$0xf] %v247_v3 }
  0x30   : > { %250 = vst [vmem:[%s219_s6 + $0x10] sm:$0xf] %v249_v4 }
  0x31   : > { %252 = vst [vmem:[%s219_s6 + $0x14] sm:$0xf] %v251_v5 }
  0x32   : > { %254 = vst [vmem:[%s219_s6 + $0x18] sm:$0xf] %v253_v6 }
  0x33   : > { %256 = vst [vmem:[%s219_s6 + $0x1c] sm:$0xf] %v255_v7 }
  0x34 PF: > { %296 = sbr.rel (!%p1961_p3) target bundleno = 66 (0x42), region = 69  ;;  %s298_s3 = sand.u32 (%p1961_p3), 1, %s1839_s22  }
  0x35   : > { %s1582_s30 = sshll.u32 (%p1961_p3), %s1855_s26, 4  ;;  %s1564_s15 = sshll.u32 (%p1961_p3), %s298_s3, 5 }
  0x36   : > { %s303_s16 = sadd.s32 (%p1961_p3), %s1851_s25, %s1582_s30  ;;  %s300_s20 = scalar_lea.vmem (%p1961_p3), [#allocation4], %s1564_s15 }
  0x37   : > { %s1567_s13 = sshll.u32 (%p1961_p3), %s303_s16, 2 }
  0x38   : > { %s305_s8 = scalar_lea.vmem (%p1961_p3), %s2634_s1, %s1567_s13 }
  0x39   : > { %v322_v8 = vld [vmem:[%s305_s8] sm:$0xf]  ;;  %v324_v9 = vld [vmem:[%s305_s8 + $0x8] sm:$0xf]  ;;  %v326_v10 = vld [vmem:[%s305_s8 + $0x10] sm:$0xf] }
  0x3a   : > { %323 = vst [vmem:[%s300_s20] sm:$0xf] %v322_v8  ;;  %v328_v11 = vld [vmem:[%s305_s8 + $0x18] sm:$0xf]  ;;  %v330_v12 = vld [vmem:[%s305_s8 + $0x20] sm:$0xf] }
  0x3b   : > { %325 = vst [vmem:[%s300_s20 + $0x4] sm:$0xf] %v324_v9  ;;  %v332_v13 = vld [vmem:[%s305_s8 + $0x28] sm:$0xf]  ;;  %v334_v14 = vld [vmem:[%s305_s8 + $0x30] sm:$0xf] }
  0x3c   : > { %327 = vst [vmem:[%s300_s20 + $0x8] sm:$0xf] %v326_v10  ;;  %v336_v15 = vld [vmem:[%s305_s8 + $0x38] sm:$0xf] }
  0x3d   : > { %329 = vst [vmem:[%s300_s20 + $0xc] sm:$0xf] %v328_v11 }
  0x3e   : > { %331 = vst [vmem:[%s300_s20 + $0x10] sm:$0xf] %v330_v12 }
  0x3f   : > { %333 = vst [vmem:[%s300_s20 + $0x14] sm:$0xf] %v332_v13 }
  0x40   : > { %335 = vst [vmem:[%s300_s20 + $0x18] sm:$0xf] %v334_v14 }
  0x41   : > { %337 = vst [vmem:[%s300_s20 + $0x1c] sm:$0xf] %v336_v15 }
  0x42 PF: > { %387 = sbr.rel (%p1994_p2) target bundleno = 745 (0x2e9), region = 114  ;;  %s390_s9 = sand.u32 (!%p1994_p2), 1, %s1835_s21  }
  0x43   : > { %s1569_s12 = sshll.u32 (!%p1994_p2), %s390_s9, 5 }
  0x44   : > { %s2025_s7 = scalar_lea.vmem (!%p1994_p2), [#allocation3], %s1569_s12  ;;  %s2027_s6 = scalar_lea.vmem (!%p1994_p2), [#allocation4], %s1569_s12 }
  0x47   : > { %1814 = dma.done.wait (%p1990_p1), [#allocation6], 4096  }
  0x48   : > { %1816 = vsyncadd (%p1990_p1), [#allocation6], 4294963200  ;;  %s434_s3 = sand.u32 1, %s1827_s19   ;;  %p439_p3 = scmp.lt.s32.totalorder %s1847_s24, 1 }
  0x49   : > { %s1572_s29 = sshll.u32 %s434_s3, 4  ;;  %p1574_p8 = scmp.ne.s32.totalorder %s1843_s23, 0 }
  0x4a   : > { %s440_s30 = scalar_select %p439_p3, %s1847_s24, 1 }
  0x4b   : > { %s2043_s10 = scalar_lea.vmem [#allocation8], %s1572_s29  ;;  %446 = sbr.rel (%p1574_p8) target bundleno = 82 (0x52), region = 130 }
  0x4c   : > { %s1573_s21 = sshll.u32 %s440_s30, 3 }
  0x4d   : > { %s2041_s13 = scalar_lea.vmem %s2635_s2, %s1573_s21 }
  0x50   : > { %v1864_v16 = vmov 0.0  }
  0x51   : > { %447 = vst [vmem:[#allocation2] sm:$0xff] %v1864_v16 }
  0x52 PF: > { %v458_v17 = vld [vmem:[%s2027_s6 + $0x8] sm:$0xf]  ;;  %v456_v18 = vld [vmem:[%s2027_s6] sm:$0xf]  ;;  %v1865_v19 = vmov 0   ;;  %v1601_v31 = vld [vmem:[%s2025_s7 + $0x10] sm:$0xff]  }
  0x53   : > { %1708 = vset.pattern.permute.xlu1 %v1865_v19  ;;  %1707 = vset.pattern.permute.xlu0 %v1865_v19  ;;  %v460_v20 = vld [vmem:[%s2027_s6 + $0x10] sm:$0xf]  ;;  %v459_v21 = vld [vmem:[%s2027_s6 + $0xc] sm:$0xf]  ;;  %v457_v22 = vld [vmem:[%s2027_s6 + $0x4] sm:$0xf]  ;;  %v1594_v33 = vunpack.c.l.bf16 %v1601_v31  ;;  %v1595_v41 = vunpack.c.h.bf16 %v1601_v31 }
  0x54   : > { %485 = vperm.xlu1 %1708, %v458_v17   ;;  %467 = vperm.xlu0 %1707, %v456_v18   ;;  %v461_v23 = vld [vmem:[%s2027_s6 + $0x14] sm:$0xf]  ;;  %v463_v24 = vld [vmem:[%s2027_s6 + $0x1c] sm:$0xf]  ;;  %v462_v25 = vld [vmem:[%s2027_s6 + $0x18] sm:$0xf] }
  0x55   : > { %1709 = vset.pattern.permute.xlu2 %v1865_v19  ;;  %v1866_v27 = vmov 839922192   ;;  %v1600_v36 = vld [vmem:[%s2025_s7 + $0x8] sm:$0xff]   ;;  %v1585_v37 = vld [vmem:[%s2025_s7] sm:$0xff]   ;;  %v1602_v10 = vld [vmem:[%s2025_s7 + $0x18] sm:$0xff]   ;;  %vm633_vm0 = vcmask 1041409  }
  0x56   : > { %503 = vperm.xlu2 %1709, %v460_v20   ;;  %v471_v28 = vunpack.c.l.s4 %v1866_v27  ;;  %v1590_v43 = vunpack.c.l.bf16 %v1600_v36  ;;  %v1586_v45 = vunpack.c.l.bf16 %v1585_v37  ;;  %v1591_v58 = vunpack.c.h.bf16 %v1600_v36  ;;  %p1575_p9 = scmp.ne.s32.totalorder %s1843_s23, 1 }
  0x57   : > { %v1587_v60 = vunpack.c.h.bf16 %v1585_v37  ;;  %v1599_v16 = vunpack.c.h.bf16 %v1602_v10  ;;  %vm635_vm1 = vcmask 1042434   ;;  %vm637_vm2 = vcmask 1043459  }
  0x58   : > { %v2054_v29 = vunpack.c.0.s8 %v471_v28  ;;  %vm639_vm3 = vcmask 1044484   ;;  %vm641_vm4 = vcmask 1045509   ;;  %vm643_vm5 = vcmask 1046534  }
  0x59   : > { %vm645_vm6 = vcmask 1047559  }
  0x5c   : > { %494 = vperm.xlu1 %1708, %v459_v21   ;;  %476 = vperm.xlu0 %1707, %v457_v22  }
  0x5e   : > { %512 = vperm.xlu2 %1709, %v461_v23  }
  0x64   : > { %530 = vperm.xlu1 %1708, %v463_v24   ;;  %521 = vperm.xlu0 %1707, %v462_v25   ;;  %v1598_v24 = vunpack.c.l.bf16 %v1602_v10 }
  0xb0   : > { %v504_v26 = vpop.permute.xlu2 %503 }
  0xb1   : > { %v509_v30 = vperm.slane %v504_v26, %v2054_v29 }
  0xb3   : > { %v549_v34 = vunpack.c.l.bf16 %v509_v30 }
  0xb5   : > { %v557_v38 = vmul.f32 %v1594_v33, %v549_v34 }
  0xb7   : > { %v565_v49 = vpack.c.bf16 %v557_v38, %v557_v38 }
  0xb8   : > { %v513_v32 = vpop.permute.xlu2 %512 }
  0xb9   : > { %v518_v35 = vperm.slane %v513_v32, %v2054_v29  ;;  %v573_v55 = vunpack.c.l.bf16 %v565_v49 }
  0xbb   : > { %v550_v42 = vunpack.c.l.bf16 %v518_v35  ;;  %v601_v5 = vrot.slane %v573_v55, 4 }
  0xbd   : > { %v558_v50 = vmul.f32 %v1595_v41, %v550_v42  ;;  %v602_v14 = vadd.f32 %v601_v5, %v573_v55 }
  0xbf   : > { %v566_v56 = vpack.c.bf16 %v558_v50, %v558_v50  ;;  %v603_v28 = vrot.slane %v602_v14, 2 }
  0xc1   : > { %v574_v7 = vunpack.c.l.bf16 %v566_v56  ;;  %v604_v41 = vadd.f32 %v603_v28, %v602_v14 }
  0xc3   : > { %v607_v19 = vrot.slane %v574_v7, 4 }
  0xc5   : > { %v608_v33 = vadd.f32 %v607_v19, %v574_v7 }
  0xc6   : > { %v486_v39 = vpop.permute.xlu1 %485  ;;  %v468_v40 = vpop.permute.xlu0 %467 }
  0xc7   : > { %v491_v44 = vperm.slane %v486_v39, %v2054_v29  ;;  %v473_v46 = vperm.slane %v468_v40, %v2054_v29 }
  0xc9   : > { %v547_v47 = vunpack.c.l.bf16 %v491_v44  ;;  %v545_v48 = vunpack.c.l.bf16 %v473_v46 }
  0xcb   : > { %v555_v51 = vmul.f32 %v1590_v43, %v547_v47  ;;  %v553_v52 = vmul.f32 %v1586_v45, %v545_v48  ;;  %v609_v45 = vrot.slane %v608_v33, 2 }
  0xcd   : > { %v563_v53 = vpack.c.bf16 %v555_v51, %v555_v51  ;;  %v561_v54 = vpack.c.bf16 %v553_v52, %v553_v52  ;;  %v605_v52 = vrot.slane %v604_v41, 1  ;;  %v610_v56 = vadd.f32 %v609_v45, %v608_v33 }
  0xce   : > { %v495_v57 = vpop.permute.xlu1 %494  ;;  %v477_v59 = vpop.permute.xlu0 %476 }
  0xcf   : > { %v571_v61 = vunpack.c.l.bf16 %v563_v53  ;;  %v569_v62 = vunpack.c.l.bf16 %v561_v54  ;;  %v500_v63 = vperm.slane %v495_v57, %v2054_v29  ;;  %v482_v0 = vperm.slane %v477_v59, %v2054_v29 }
  0xd1   : > { %v589_v1 = vrot.slane %v571_v61, 4  ;;  %v577_v2 = vrot.slane %v569_v62, 4  ;;  %v548_v3 = vunpack.c.l.bf16 %v500_v63  ;;  %v546_v4 = vunpack.c.l.bf16 %v482_v0 }
  0xd3   : > { %v578_v6 = vadd.f32 %v577_v2, %v569_v62  ;;  %v556_v8 = vmul.f32 %v1591_v58, %v548_v3  ;;  %v554_v9 = vmul.f32 %v1587_v60, %v546_v4  ;;  %v590_v11 = vadd.f32 %v589_v1, %v571_v61 }
  0xd4   : > { %v611_v2 = vrot.slane %v610_v56, 1  ;;  %v606_v4 = vadd.f32 %v605_v52, %v604_v41 }
  0xd5   : > { %v564_v12 = vpack.c.bf16 %v556_v8, %v556_v8  ;;  %v562_v13 = vpack.c.bf16 %v554_v9, %v554_v9  ;;  %v579_v18 = vrot.slane %v578_v6, 2  ;;  %v591_v22 = vrot.slane %v590_v11, 2 }
  0xd6   : > { %v531_v15 = vpop.permute.xlu1 %530  ;;  %v522_v17 = vpop.permute.xlu0 %521  ;;  %v612_v10 = vadd.f32 %v611_v2, %v610_v56 }
  0xd7   : > { %v572_v20 = vunpack.c.l.bf16 %v564_v12  ;;  %v570_v21 = vunpack.c.l.bf16 %v562_v13  ;;  %v536_v23 = vperm.slane %v531_v15, %v2054_v29  ;;  %v527_v25 = vperm.slane %v522_v17, %v2054_v29  ;;  %v464_v13 = vld [vmem:[#allocation2] sm:$0xff] }
  0xd8   : > { %v580_v32 = vadd.f32 %v579_v18, %v578_v6  ;;  %v592_v36 = vadd.f32 %v591_v22, %v590_v11 }
  0xd9   : > { %v595_v26 = vrot.slane %v572_v20, 4  ;;  %v583_v27 = vrot.slane %v570_v21, 4  ;;  %v552_v30 = vunpack.c.l.bf16 %v536_v23  ;;  %v551_v31 = vunpack.c.l.bf16 %v527_v25 }
  0xda   : > { %v581_v44 = vrot.slane %v580_v32, 1  ;;  %v593_v47 = vrot.slane %v592_v36, 1 }
  0xdb   : > { %v596_v34 = vadd.f32 %v595_v26, %v572_v20  ;;  %v584_v35 = vadd.f32 %v583_v27, %v570_v21  ;;  %v560_v37 = vmul.f32 %v1599_v16, %v552_v30  ;;  %v559_v38 = vmul.f32 %v1598_v24, %v551_v31 }
  0xdc   : > { %v582_v55 = vadd.f32 %v581_v44, %v580_v32  ;;  %v594_v58 = vadd.f32 %v593_v47, %v592_v36 }
  0xdd   : > { %v597_v39 = vrot.slane %v596_v34, 2  ;;  %v585_v40 = vrot.slane %v584_v35, 2  ;;  %v568_v42 = vpack.c.bf16 %v560_v37, %v560_v37  ;;  %v567_v43 = vpack.c.bf16 %v559_v38, %v559_v38 }
  0xdf   : > { %v598_v29 = vadd.f32 %v597_v39, %v596_v34  ;;  %v586_v46 = vadd.f32 %v585_v40, %v584_v35  ;;  %v576_v48 = vunpack.c.l.bf16 %v568_v42  ;;  %v575_v49 = vunpack.c.l.bf16 %v567_v43 }
  0xe1   : > { %v599_v50 = vrot.slane %v598_v29, 1  ;;  %v587_v51 = vrot.slane %v586_v46, 1  ;;  %v619_v53 = vrot.slane %v576_v48, 4  ;;  %v613_v54 = vrot.slane %v575_v49, 4 }
  0xe3   : > { %v588_v57 = vadd.f32 %v587_v51, %v586_v46  ;;  %v620_v59 = vadd.f32 %v619_v53, %v576_v48  ;;  %v614_v60 = vadd.f32 %v613_v54, %v575_v49  ;;  %v600_v61 = vadd.f32 %v599_v50, %v598_v29 }
  0xe5   : > { %v634_v62 = vsel %vm633_vm0, %v588_v57, %v582_v55  ;;  %v621_v0 = vrot.slane %v620_v59, 2  ;;  %v615_v1 = vrot.slane %v614_v60, 2 }
  0xe6   : > { %v636_v63 = vsel %vm635_vm1, %v594_v58, %v634_v62 }
  0xe7   : > { %v638_v3 = vsel %vm637_vm2, %v600_v61, %v636_v63  ;;  %v622_v5 = vadd.f32 %v621_v0, %v620_v59  ;;  %v616_v6 = vadd.f32 %v615_v1, %v614_v60 }
  0xe8   : > { %v640_v9 = vsel %vm639_vm3, %v606_v4, %v638_v3 }
  0xe9   : > { %v623_v7 = vrot.slane %v622_v5, 1  ;;  %v617_v8 = vrot.slane %v616_v6, 1  ;;  %v642_v14 = vsel %vm641_vm4, %v612_v10, %v640_v9 }
  0xeb   : > { %v624_v11 = vadd.f32 %v623_v7, %v622_v5  ;;  %v618_v12 = vadd.f32 %v617_v8, %v616_v6 }
  0xed   : > { %v644_v15 = vsel %vm643_vm5, %v618_v12, %v642_v14  ;;  %653 = sbr.rel (%p1575_p9) target bundleno = 730 (0x2da), region = 134 }
  0xee   : > { %v646_v16 = vsel %vm645_vm6, %v624_v11, %v644_v15 }
  0xef   : > { %v648_v17 = vadd.f32 %v646_v16, %v464_v13 }
  0xf1   : > { %649 = vst [vmem:[#allocation2] sm:$0xff] %v648_v17 }
  0xf2   : > { %v691_v18 = vld [vmem:[#allocation5 + $0x78] sm:$0xff]  ;;  %v690_v20 = vld [vmem:[#allocation5 + $0x70] sm:$0xff]  ;;  %v1867_v22 = vmov 0   ;;  %v689_v23 = vld [vmem:[#allocation5 + $0x68] sm:$0xff] }
  0xf3   : > { %v655_v19 = vld [vmem:[%s2041_s13] sm:$0xff]  ;;  %v2070_v21 = vand.u32 4294901760, %v691_v18  ;;  %1710 = vset.pattern.permute.xlu0 %v1867_v22  ;;  %v688_v24 = vld [vmem:[#allocation5 + $0x60] sm:$0xff]  ;;  %v2072_v25 = vand.u32 4294901760, %v690_v20  ;;  %v2074_v26 = vand.u32 4294901760, %v689_v23  ;;  %v686_v40 = vld [vmem:[#allocation5 + $0x50] sm:$0xff] }
  0xf4   : > { %1711 = vrcp.f32 %v655_v19  ;;  %v2081_v28 = vand.u32 4294901760, %v688_v24  ;;  %v687_v32 = vld [vmem:[#allocation5 + $0x58] sm:$0xff]  ;;  %vm661_vm7 = vweird.f32 %v655_v19  ;;  %v667_v44 = vand.u32 2147483648, %v655_v19  ;;  %v685_v52 = vld [vmem:[#allocation5 + $0x48] sm:$0xff]  ;;  %v684_v62 = vld [vmem:[#allocation5 + $0x40] sm:$0xff] }
  0xf5   : > { %v2077_v27 = vsub.f32 %v691_v18, %v2070_v21  ;;  %911 = vmatpush.xpose.msra.mxu3 %v2070_v21  ;;  %715 = vmatpush.xpose.msra.mxu0 %v2070_v21  ;;  %v2084_v30 = vsub.f32 %v690_v20, %v2072_v25  ;;  %v2087_v31 = vsub.f32 %v689_v23, %v2074_v26  ;;  %v2101_v39 = vand.u32 4294901760, %v687_v32  ;;  %v683_v5 = vld [vmem:[#allocation5 + $0x38] sm:$0xff]  ;;  %v682_v11 = vld [vmem:[#allocation5 + $0x30] sm:$0xff]  ;;  %v681_v17 = vld [vmem:[#allocation5 + $0x28] sm:$0xff] }
  0xf6   : > { %v2099_v38 = vsub.f32 %v688_v24, %v2081_v28  ;;  %v665_v29 = vand.u32 2147483647, %v655_v19  ;;  %v2107_v46 = vand.u32 4294901760, %v686_v40  ;;  %v668_v54 = vor.u32 1.1754944e-38, %v667_v44  ;;  %v680_v24 = vld [vmem:[#allocation5 + $0x20] sm:$0xff] }
  0xf7   : > { %v757_v33 = vand.u32 4294901760, %v2077_v27  ;;  %858 = vmatpush.xpose.msra.mxu2 %v2077_v27  ;;  %v763_v34 = vand.u32 4294901760, %v2084_v30  ;;  %v769_v37 = vand.u32 4294901760, %v2087_v31  ;;  %v2115_v50 = vsub.f32 %v687_v32, %v2101_v39 }
  0xf8   : > { %v775_v49 = vand.u32 4294901760, %v2099_v38  ;;  %vm666_vm10 = vcmp.eq.f32.partialorder %v665_v29, 8.507059e+37  ;;  %v2125_v56 = vsub.f32 %v686_v40, %v2107_v46  ;;  %v2132_v60 = vand.u32 4294901760, %v685_v52 }
  0xf9   : > { %v758_v36 = vsub.f32 %v2077_v27, %v757_v33  ;;  %913 = vmatpush.xpose.msra.mxu3 %v2072_v25  ;;  %717 = vmatpush.xpose.msra.mxu0 %v2072_v25  ;;  %v764_v42 = vsub.f32 %v2084_v30, %v763_v34  ;;  %v770_v48 = vsub.f32 %v2087_v31, %v769_v37  ;;  %v781_v59 = vand.u32 4294901760, %v2115_v50  ;;  %v700_v27 = vld [vmem:[#allocation5 + $0xc0] sm:$0xff] }
  0xfa   : > { %v1712_v35 = vpop.eup %1711  ;;  %v776_v58 = vsub.f32 %v2099_v38, %v775_v49  ;;  %v787_v0 = vand.u32 4294901760, %v2125_v56  ;;  %v2144_v3 = vsub.f32 %v685_v52, %v2132_v60  ;;  %v2146_v4 = vand.u32 4294901760, %v684_v62 }
  0xfb   : > { %v657_v41 = vmul.f32 %v1712_v35, %v655_v19  ;;  %v759_v43 = vand.u32 4294901760, %v758_v36  ;;  %861 = vmatpush.xpose.msra.mxu2 %v2084_v30  ;;  %vm662_vm8 = vweird.f32 %v1712_v35  ;;  %v765_v47 = vand.u32 4294901760, %v764_v42  ;;  %v679_v42 = vld [vmem:[#allocation5 + $0x18] sm:$0xff] }
  0xfc   : > { %vm2119_vm9 = vmor %vm661_vm7, %vm662_vm8  ;;  %v771_v57 = vand.u32 4294901760, %v770_v48  ;;  %v777_v1 = vand.u32 4294901760, %v776_v58  ;;  %v782_v2 = vsub.f32 %v2115_v50, %v781_v59  ;;  %v788_v6 = vsub.f32 %v2125_v56, %v787_v0  ;;  %v678_v48 = vld [vmem:[#allocation5 + $0x10] sm:$0xff]  ;;  %v677_v58 = vld [vmem:[#allocation5 + $0x8] sm:$0xff] }
  0xfd   : > { %v658_v45 = vsub.f32 1.0, %v657_v41  ;;  %760 = vmatpush.xpose.msra.mxu1 %v759_v43  ;;  %915 = vmatpush.xpose.msra.mxu3 %v2074_v26  ;;  %v793_v8 = vand.u32 4294901760, %v2144_v3  ;;  %v2156_v9 = vsub.f32 %v684_v62, %v2146_v4  ;;  %v2158_v10 = vand.u32 4294901760, %v683_v5  ;;  %v706_v62 = vld [vmem:[#allocation5 + $0xf0] sm:$0xff]  ;;  %v699_v30 = vld [vmem:[#allocation5 + $0xb8] sm:$0xff] }
  0xfe   : > { %719 = vmatpush.xpose.msra.mxu0 %v2074_v26  ;;  %v783_v7 = vand.u32 4294901760, %v782_v2  ;;  %v789_v12 = vand.u32 4294901760, %v788_v6  ;;  %v2170_v16 = vand.u32 4294901760, %v682_v11  ;;  %v2174_v18 = vand.u32 4294901760, %v681_v17 }
  0xff   : > { %v659_v51 = vmul.f32 %v1712_v35, %v658_v45  ;;  %864 = vmatpush.xpose.msra.mxu2 %v2087_v31  ;;  %v794_v13 = vsub.f32 %v2144_v3, %v793_v8  ;;  %v799_v14 = vand.u32 4294901760, %v2156_v9  ;;  %v2168_v15 = vsub.f32 %v683_v5, %v2158_v10  ;;  %v698_v31 = vld [vmem:[#allocation5 + $0xb0] sm:$0xff] }
 0x100   : > { %v2182_v23 = vsub.f32 %v682_v11, %v2170_v16  ;;  %v2186_v32 = vand.u32 4294901760, %v680_v24  ;;  %v2194_v41 = vsub.f32 %v681_v17, %v2174_v18  ;;  %v2201_v44 = vand.u32 4294901760, %v679_v42  ;;  %v676_v11 = vld [vmem:[#allocation5] sm:$0xff] }
 0x101   : > { %v660_v55 = vadd.f32 %v1712_v35, %v659_v51  ;;  %766 = vmatpush.xpose.msra.mxu1 %v765_v47  ;;  %917 = vmatpush.xpose.msra.mxu3 %v2081_v28  ;;  %v795_v19 = vand.u32 4294901760, %v794_v13  ;;  %v800_v20 = vsub.f32 %v2156_v9, %v799_v14  ;;  %v2652_v22 = vand.u32 4294901760, %v2168_v15  ;;  %v707_v51 = vld [vmem:[#allocation5 + $0xf8] sm:$0xff]  ;;  %v705_v13 = vld [vmem:[#allocation5 + $0xe8] sm:$0xff] }
 0x102   : > { %721 = vmatpush.xpose.msra.mxu0 %v2081_v28  ;;  %v2649_v40 = vand.u32 4294901760, %v2182_v23  ;;  %v2199_v43 = vsub.f32 %v680_v24, %v2186_v32  ;;  %v2647_v47 = vand.u32 4294901760, %v2194_v41  ;;  %v2212_v53 = vsub.f32 %v679_v42, %v2201_v44 }
 0x103   : > { %v664_v61 = vsel %vm2119_vm9, %v1712_v35, %v660_v55  ;;  %867 = vmatpush.xpose.msra.mxu2 %v2099_v38  ;;  %v801_v35 = vand.u32 4294901760, %v800_v20  ;;  %v806_v36 = vsub.f32 %v2168_v15, %v2652_v22  ;;  %v2232_v6 = vand.u32 4294901760, %v677_v58  ;;  %v697_v38 = vld [vmem:[#allocation5 + $0xa8] sm:$0xff] }
 0x104   : > { %v669_v63 = vsel %vm666_vm10, %v668_v54, %v664_v61  ;;  %v812_v29 = vsub.f32 %v2182_v23, %v2649_v40  ;;  %v2646_v52 = vand.u32 4294901760, %v2199_v43  ;;  %v818_v55 = vsub.f32 %v2194_v41, %v2647_v47 }
 0x105   : > { %672 = vperm.xlu0 %1710, %v669_v63   ;;  %772 = vmatpush.xpose.msra.mxu1 %v771_v57  ;;  %v807_v45 = vand.u32 4294901760, %v806_v36  ;;  %v2218_v57 = vand.u32 4294901760, %v678_v48  ;;  %v2221_v61 = vand.u32 4294901760, %v707_v51  ;;  %v2247_v24 = vsub.f32 %v677_v58, %v2232_v6 }
 0x106   : > { %919 = vmatpush.xpose.msra.mxu3 %v2101_v39  ;;  %723 = vmatpush.xpose.msra.mxu0 %v2101_v39  ;;  %v813_v54 = vand.u32 4294901760, %v812_v29  ;;  %v824_v63 = vsub.f32 %v2199_v43, %v2646_v52  ;;  %v819_v2 = vand.u32 4294901760, %v818_v55  ;;  %v704_v29 = vld [vmem:[#allocation5 + $0xe0] sm:$0xff] }
 0x107   : > { %870 = vmatpush.xpose.msra.mxu2 %v2115_v50  ;;  %v2230_v5 = vsub.f32 %v678_v48, %v2218_v57  ;;  %v696_v50 = vld [vmem:[#allocation5 + $0xa0] sm:$0xff] }
 0x108   : > { %v825_v17 = vand.u32 4294901760, %v824_v63 }
 0x109   : > { %778 = vmatpush.xpose.msra.mxu1 %v777_v1  ;;  %v2644_v1 = vand.u32 4294901760, %v2212_v53  ;;  %v2642_v20 = vand.u32 4294901760, %v2230_v5 }
 0x10a   : > { %921 = vmatpush.xpose.msra.mxu3 %v2107_v46  ;;  %725 = vmatpush.xpose.msra.mxu0 %v2107_v46 }
 0x10b   : > { %873 = vmatpush.xpose.msra.mxu2 %v2125_v56  ;;  %v695_v56 = vld [vmem:[#allocation5 + $0x98] sm:$0xff] }
 0x10d   : > { %784 = vmatpush.xpose.msra.mxu1 %v783_v7  ;;  %v2234_v7 = vand.u32 4294901760, %v706_v62 }
 0x10e   : > { %923 = vmatpush.xpose.msra.mxu3 %v2132_v60  ;;  %727 = vmatpush.xpose.msra.mxu0 %v2132_v60 }
 0x10f   : > { %876 = vmatpush.xpose.msra.mxu2 %v2144_v3  ;;  %v2252_v36 = vsub.f32 %v706_v62, %v2234_v7  ;;  %v694_v3 = vld [vmem:[#allocation5 + $0x90] sm:$0xff] }
 0x111   : > { %790 = vmatpush.xpose.msra.mxu1 %v789_v12  ;;  %v2238_v12 = vsub.f32 %v707_v51, %v2221_v61  ;;  %v836_v51 = vsub.f32 %v2230_v5, %v2642_v20  ;;  %v2648_v58 = vand.u32 4294901760, %v2252_v36 }
 0x112   : > { %925 = vmatpush.xpose.msra.mxu3 %v2146_v4  ;;  %729 = vmatpush.xpose.msra.mxu0 %v2146_v4 }
 0x113   : > { %879 = vmatpush.xpose.msra.mxu2 %v2156_v9  ;;  %v2643_v42 = vand.u32 4294901760, %v2238_v12  ;;  %v2667_v9 = vand.u32 4294901760, %v2168_v15 }
 0x115   : > { %796 = vmatpush.xpose.msra.mxu1 %v795_v19  ;;  %v830_v19 = vsub.f32 %v2212_v53, %v2644_v1  ;;  %v1099_v62 = vsub.f32 %v2238_v12, %v2643_v42 }
 0x116   : > { %927 = vmatpush.xpose.msra.mxu3 %v2158_v10  ;;  %731 = vmatpush.xpose.msra.mxu0 %v2158_v10 }
 0x117   : > { %882 = vmatpush.xpose.msra.mxu2 %v2168_v15  ;;  %v831_v48 = vand.u32 4294901760, %v830_v19  ;;  %v837_v19 = vand.u32 4294901760, %v836_v51  ;;  %v1100_v42 = vand.u32 4294901760, %v1099_v62  ;;  %v2668_v15 = vand.u32 4294901760, %v2182_v23 }
 0x119   : > { %802 = vmatpush.xpose.msra.mxu1 %v801_v35  ;;  %v2249_v35 = vand.u32 4294901760, %v676_v11 }
 0x11a   : > { %929 = vmatpush.xpose.msra.mxu3 %v2170_v16  ;;  %733 = vmatpush.xpose.msra.mxu0 %v2170_v16 }
 0x11b   : > { %885 = vmatpush.xpose.msra.mxu2 %v2182_v23  ;;  %v2265_v55 = vsub.f32 %v676_v11, %v2249_v35  ;;  %v2669_v23 = vand.u32 4294901760, %v2194_v41 }
 0x11d   : > { %808 = vmatpush.xpose.msra.mxu1 %v807_v45  ;;  %v2256_v45 = vand.u32 4294901760, %v705_v13  ;;  %v2651_v20 = vand.u32 4294901760, %v2265_v55 }
 0x11e   : > { %931 = vmatpush.xpose.msra.mxu3 %v2174_v18  ;;  %735 = vmatpush.xpose.msra.mxu0 %v2174_v18 }
 0x11f   : > { %888 = vmatpush.xpose.msra.mxu2 %v2194_v41  ;;  %v2273_v63 = vsub.f32 %v705_v13, %v2256_v45  ;;  %v1105_v13 = vsub.f32 %v2252_v36, %v2648_v58  ;;  %v848_v47 = vsub.f32 %v2265_v55, %v2651_v20 }
 0x121   : > { %814 = vmatpush.xpose.msra.mxu1 %v813_v54  ;;  %v2645_v54 = vand.u32 4294901760, %v2247_v24  ;;  %v2650_v1 = vand.u32 4294901760, %v2273_v63  ;;  %v1106_v58 = vand.u32 4294901760, %v1105_v13 }
 0x122   : > { %933 = vmatpush.xpose.msra.mxu3 %v2186_v32  ;;  %737 = vmatpush.xpose.msra.mxu0 %v2186_v32 }
 0x123   : > { %891 = vmatpush.xpose.msra.mxu2 %v2199_v43  ;;  %v842_v11 = vsub.f32 %v2247_v24, %v2645_v54  ;;  %v702_v54 = vld [vmem:[#allocation5 + $0xd0] sm:$0xff] }
 0x125   : > { %820 = vmatpush.xpose.msra.mxu1 %v819_v2  ;;  %v2275_v2 = vand.u32 4294901760, %v704_v29  ;;  %v843_v52 = vand.u32 4294901760, %v842_v11  ;;  %v701_v11 = vld [vmem:[#allocation5 + $0xc8] sm:$0xff] }
 0x126   : > { %935 = vmatpush.xpose.msra.mxu3 %v2201_v44  ;;  %739 = vmatpush.xpose.msra.mxu0 %v2201_v44  ;;  %v2312_v13 = vand.u32 4294901760, %v701_v11 }
 0x127   : > { %894 = vmatpush.xpose.msra.mxu2 %v2212_v53 }
 0x129   : > { %826 = vmatpush.xpose.msra.mxu1 %v825_v17  ;;  %v703_v17 = vld [vmem:[#allocation5 + $0xd8] sm:$0xff] }
 0x12a   : > { %937 = vmatpush.xpose.msra.mxu3 %v2218_v57  ;;  %741 = vmatpush.xpose.msra.mxu0 %v2218_v57  ;;  %v2291_v51 = vand.u32 4294901760, %v703_v17 }
 0x12b   : > { %897 = vmatpush.xpose.msra.mxu2 %v2230_v5 }
 0x12c   : > { %v2304_v40 = vsub.f32 %v703_v17, %v2291_v51 }
 0x12d   : > { %832 = vmatpush.xpose.msra.mxu1 %v831_v48  ;;  %v2289_v48 = vsub.f32 %v704_v29, %v2275_v2  ;;  %v1111_v29 = vsub.f32 %v2273_v63, %v2650_v1 }
 0x12e   : > { %939 = vmatpush.xpose.msra.mxu3 %v2232_v6  ;;  %743 = vmatpush.xpose.msra.mxu0 %v2232_v6  ;;  %v1122_v20 = vand.u32 4294901760, %v2304_v40 }
 0x12f   : > { %900 = vmatpush.xpose.msra.mxu2 %v2247_v24  ;;  %v1116_v62 = vand.u32 4294901760, %v2289_v48  ;;  %v1112_v1 = vand.u32 4294901760, %v1111_v29 }
 0x131   : > { %838 = vmatpush.xpose.msra.mxu1 %v837_v19  ;;  %v2306_v19 = vand.u32 4294901760, %v702_v54  ;;  %v1117_v17 = vsub.f32 %v2289_v48, %v1116_v62 }
 0x132   : > { %941 = vmatpush.xpose.msra.mxu3 %v2249_v35  ;;  %745 = vmatpush.xpose.msra.mxu0 %v2249_v35 }
 0x133   : > { %903 = vmatpush.xpose.msra.mxu2 %v2265_v55  ;;  %v2319_v22 = vsub.f32 %v702_v54, %v2306_v19 }
 0x135   : > { %844 = vmatpush.xpose.msra.mxu1 %v843_v52  ;;  %v1123_v52 = vsub.f32 %v2304_v40, %v1122_v20  ;;  %v1128_v54 = vand.u32 4294901760, %v2319_v22 }
 0x136   : > { %1101 = vmatpush.xpose.msrb.mxu3 %v1100_v42  ;;  %952 = vmatpush.xpose.msrb.mxu0 %v757_v33  ;;  %v849_v42 = vand.u32 4294901760, %v848_v47  ;;  %v2325_v33 = vsub.f32 %v701_v11, %v2312_v13  ;;  %v1118_v47 = vand.u32 4294901760, %v1117_v17  ;;  %v2345_v11 = vand.u32 4294901760, %v699_v30 }
 0x137   : > { %1056 = vmatpush.xpose.msrb.mxu2 %v2221_v61 }
 0x138   : > { %v2356_v17 = vsub.f32 %v699_v30, %v2345_v11  ;;  %v2371_v30 = vand.u32 4294901760, %v697_v38 }
 0x139   : > { %850 = vmatpush.xpose.msra.mxu1 %v849_v42 }
 0x13a   : > { %1107 = vmatpush.xpose.msrb.mxu3 %v1106_v58  ;;  %956 = vmatpush.xpose.msrb.mxu0 %v763_v34  ;;  %v2332_v58 = vand.u32 4294901760, %v700_v27  ;;  %v1134_v34 = vand.u32 4294901760, %v2325_v33 }
 0x13b   : > { %1058 = vmatpush.xpose.msrb.mxu2 %v2234_v7 }
 0x13c   : > { %v2343_v29 = vsub.f32 %v700_v27, %v2332_v58  ;;  %v2358_v27 = vand.u32 4294901760, %v698_v31 }
 0x13d   : > { %1019 = vmatpush.xpose.msrb.mxu1 %v2070_v21  ;;  %v1124_v21 = vand.u32 4294901760, %v1123_v52 }
 0x13e   : > { %1113 = vmatpush.xpose.msrb.mxu3 %v1112_v1  ;;  %960 = vmatpush.xpose.msrb.mxu0 %v769_v37  ;;  %v1129_v1 = vsub.f32 %v2319_v22, %v1128_v54  ;;  %v1140_v42 = vand.u32 4294901760, %v2343_v29  ;;  %v2369_v52 = vsub.f32 %v698_v31, %v2358_v27  ;;  %v2384_v31 = vsub.f32 %v697_v38, %v2371_v30 }
 0x13f   : > { %1060 = vmatpush.xpose.msrb.mxu2 %v2256_v45  ;;  %v2397_v38 = vand.u32 4294901760, %v695_v56 }
 0x140   : > { %v1130_v37 = vand.u32 4294901760, %v1129_v1  ;;  %v1152_v1 = vand.u32 4294901760, %v2369_v52 }
 0x141   : > { %1021 = vmatpush.xpose.msrb.mxu1 %v2072_v25  ;;  %v1135_v25 = vsub.f32 %v2325_v33, %v1134_v34 }
 0x142   : > { %1119 = vmatpush.xpose.msrb.mxu3 %v1118_v47  ;;  %964 = vmatpush.xpose.msrb.mxu0 %v775_v49  ;;  %v1146_v47 = vand.u32 4294901760, %v2356_v17 }
 0x143   : > { %1062 = vmatpush.xpose.msrb.mxu2 %v2275_v2  ;;  %v1136_v49 = vand.u32 4294901760, %v1135_v25  ;;  %v1153_v25 = vsub.f32 %v2369_v52, %v1152_v1 }
 0x145   : > { %1023 = vmatpush.xpose.msrb.mxu1 %v2074_v26  ;;  %v1141_v26 = vsub.f32 %v2343_v29, %v1140_v42 }
 0x146   : > { %1125 = vmatpush.xpose.msrb.mxu3 %v1124_v21  ;;  %968 = vmatpush.xpose.msrb.mxu0 %v781_v59  ;;  %v2376_v59 = vand.u32 4294901760, %v696_v50  ;;  %v1147_v21 = vsub.f32 %v2356_v17, %v1146_v47 }
 0x147   : > { %1064 = vmatpush.xpose.msrb.mxu2 %v2291_v51 }
 0x149   : > { %1025 = vmatpush.xpose.msrb.mxu1 %v2081_v28  ;;  %v1142_v28 = vand.u32 4294901760, %v1141_v26  ;;  %v2408_v26 = vsub.f32 %v695_v56, %v2397_v38 }
 0x14a   : > { %1131 = vmatpush.xpose.msrb.mxu3 %v1130_v37  ;;  %972 = vmatpush.xpose.msrb.mxu0 %v787_v0  ;;  %v2390_v0 = vsub.f32 %v696_v50, %v2376_v59  ;;  %v1158_v37 = vand.u32 4294901760, %v2384_v31  ;;  %v2410_v50 = vand.u32 4294901760, %v694_v3 }
 0x14b   : > { %1066 = vmatpush.xpose.msrb.mxu2 %v2306_v19 }
 0x14c   : > { %v2421_v56 = vsub.f32 %v694_v3, %v2410_v50 }
 0x14d   : > { %1027 = vmatpush.xpose.msrb.mxu1 %v2101_v39  ;;  %v1148_v39 = vand.u32 4294901760, %v1147_v21  ;;  %v1170_v21 = vand.u32 4294901760, %v2408_v26 }
 0x14e   : > { %1137 = vmatpush.xpose.msrb.mxu3 %v1136_v49  ;;  %976 = vmatpush.xpose.msrb.mxu0 %v793_v8  ;;  %v1164_v8 = vand.u32 4294901760, %v2390_v0  ;;  %v1159_v49 = vsub.f32 %v2384_v31, %v1158_v37 }
 0x14f   : > { %1068 = vmatpush.xpose.msrb.mxu2 %v2312_v13 }
 0x151   : > { %1029 = vmatpush.xpose.msrb.mxu1 %v2107_v46  ;;  %v1154_v46 = vand.u32 4294901760, %v1153_v25  ;;  %v692_v25 = vld [vmem:[#allocation5 + $0x80] sm:$0xff] }
 0x152   : > { %1143 = vmatpush.xpose.msrb.mxu3 %v1142_v28  ;;  %980 = vmatpush.xpose.msrb.mxu0 %v799_v14  ;;  %v693_v14 = vld [vmem:[#allocation5 + $0x88] sm:$0xff]  ;;  %v1160_v28 = vand.u32 4294901760, %v1159_v49  ;;  %v2436_v49 = vand.u32 4294901760, %v692_v25 }
 0x153   : > { %1070 = vmatpush.xpose.msrb.mxu2 %v2332_v58 }
 0x155   : > { %1031 = vmatpush.xpose.msrb.mxu1 %v2132_v60  ;;  %v1165_v60 = vsub.f32 %v2390_v0, %v1164_v8 }
 0x156   : > { %1149 = vmatpush.xpose.msrb.mxu3 %v1148_v39  ;;  %984 = vmatpush.xpose.msrb.mxu0 %v2667_v9  ;;  %v2423_v39 = vand.u32 4294901760, %v693_v14 }
 0x157   : > { %1072 = vmatpush.xpose.msrb.mxu2 %v2345_v11  ;;  %v1166_v9 = vand.u32 4294901760, %v1165_v60 }
 0x158   : > { %v2434_v3 = vsub.f32 %v693_v14, %v2423_v39  ;;  %v2447_v14 = vsub.f32 %v692_v25, %v2436_v49  ;;  %v2672_v25 = vand.u32 4294901760, %v2230_v5  ;;  %v654_v5 = vld [vmem:[#allocation2] sm:$0xff] }
 0x159   : > { %1033 = vmatpush.xpose.msrb.mxu1 %v2146_v4  ;;  %v1171_v4 = vsub.f32 %v2408_v26, %v1170_v21 }
 0x15a   : > { %1155 = vmatpush.xpose.msrb.mxu3 %v1154_v46  ;;  %988 = vmatpush.xpose.msrb.mxu0 %v2668_v15  ;;  %v1176_v46 = vand.u32 4294901760, %v2421_v56  ;;  %v2670_v15 = vand.u32 4294901760, %v2199_v43 }
 0x15b   : > { %1074 = vmatpush.xpose.msrb.mxu2 %v2358_v27 }
 0x15c   : > { %v1177_v60 = vsub.f32 %v2421_v56, %v1176_v46 }
 0x15d   : > { %1035 = vmatpush.xpose.msrb.mxu1 %v2158_v10  ;;  %v1172_v10 = vand.u32 4294901760, %v1171_v4  ;;  %v2671_v4 = vand.u32 4294901760, %v2212_v53 }
 0x15e   : > { %1161 = vmatpush.xpose.msrb.mxu3 %v1160_v28  ;;  %992 = vmatpush.xpose.msrb.mxu0 %v2669_v23  ;;  %v1182_v28 = vand.u32 4294901760, %v2434_v3  ;;  %v2673_v23 = vand.u32 4294901760, %v2247_v24 }
 0x15f   : > { %1076 = vmatpush.xpose.msrb.mxu2 %v2371_v30 }
 0x160   : > { %v1183_v41 = vsub.f32 %v2434_v3, %v1182_v28 }
 0x161   : > { %1037 = vmatpush.xpose.msrb.mxu1 %v2170_v16  ;;  %v1178_v16 = vand.u32 4294901760, %v1177_v60 }
 0x162   : > { %1167 = vmatpush.xpose.msrb.mxu3 %v1166_v9  ;;  %996 = vmatpush.xpose.msrb.mxu0 %v2670_v15  ;;  %v1188_v9 = vand.u32 4294901760, %v2447_v14  ;;  %v1184_v43 = vand.u32 4294901760, %v1183_v41  ;;  %v2676_v15 = vand.u32 4294901760, %v2252_v36 }
 0x163   : > { %1078 = vmatpush.xpose.msrb.mxu2 %v2376_v59 }
 0x165   : > { %1039 = vmatpush.xpose.msrb.mxu1 %v2174_v18  ;;  %v1189_v18 = vsub.f32 %v2447_v14, %v1188_v9 }
 0x166   : > { %1173 = vmatpush.xpose.msrb.mxu3 %v1172_v10  ;;  %1000 = vmatpush.xpose.msrb.mxu0 %v2671_v4 }
 0x167   : > { %1080 = vmatpush.xpose.msrb.mxu2 %v2397_v38  ;;  %v1190_v53 = vand.u32 4294901760, %v1189_v18 }
 0x169   : > { %1041 = vmatpush.xpose.msrb.mxu1 %v2186_v32  ;;  %v2674_v32 = vand.u32 4294901760, %v2265_v55 }
 0x16a   : > { %1179 = vmatpush.xpose.msrb.mxu3 %v1178_v16  ;;  %1004 = vmatpush.xpose.msrb.mxu0 %v2672_v25  ;;  %v2677_v16 = vand.u32 4294901760, %v2273_v63 }
 0x16b   : > { %1082 = vmatpush.xpose.msrb.mxu2 %v2410_v50 }
 0x16d   : > { %1043 = vmatpush.xpose.msrb.mxu1 %v2201_v44 }
 0x16e   : > { %1185 = vmatpush.xpose.msrb.mxu3 %v1184_v43  ;;  %1008 = vmatpush.xpose.msrb.mxu0 %v2673_v23 }
 0x16f   : > { %1084 = vmatpush.xpose.msrb.mxu2 %v2423_v39 }
 0x171   : > { %1045 = vmatpush.xpose.msrb.mxu1 %v2218_v57 }
 0x172   : > { %1191 = vmatpush.xpose.msrb.mxu3 %v1190_v53  ;;  %1012 = vmatpush.xpose.msrb.mxu0 %v2674_v32 }
 0x173   : > { %1086 = vmatpush.xpose.msrb.mxu2 %v2436_v49 }
 0x175   : > { %1047 = vmatpush.xpose.msrb.mxu1 %v2232_v6  ;;  %v2675_v6 = vand.u32 4294901760, %v2238_v12 }
 0x177   : > { %v673_v10 = vpop.permute.xlu0 %672 }
 0x178   : > { %v675_v44 = vmul.f32 %v673_v10, %v654_v5 }
 0x179   : > { %1049 = vmatpush.xpose.msrb.mxu1 %v2249_v35 }
 0x17a   : > { %v2477_v60 = vand.u32 4294901760, %v675_v44 }
 0x17c   : > { %v2480_v24 = vsub.f32 %v675_v44, %v2477_v60  ;;  %852 = vmatmul.f32.vlgmr.msra.gmra.mxu1 %v2477_v60 }
 0x17d   : > { %1252 = vmatpush.xpose.msra.mxu1 %v2221_v61 }
 0x17e   : > { %906 = vmatmul.f32.vlgmr.msra.gmra.mxu2 %v2480_v24  ;;  %v2486_v57 = vand.u32 4294901760, %v2480_v24 }
 0x17f   : > { %1293 = vmatpush.xpose.msra.mxu2 %v2675_v6 }
 0x180   : > { %945 = vmatmul.f32.vlgmr.msra.gmra.mxu3 %v2486_v57  ;;  %v749_v35 = vsub.f32 %v2480_v24, %v2486_v57 }
 0x181   : > { %1254 = vmatpush.xpose.msra.mxu1 %v2234_v7  ;;  %1360 = vmatpush.xpose.msra.mxu3 %v2221_v61 }
 0x182   : > { %v750_v55 = vand.u32 4294901760, %v749_v35 }
 0x183   : > { %1297 = vmatpush.xpose.msra.mxu2 %v2676_v15 }
 0x184   : > { %751 = vmatmul.f32.vlgmr.msra.gmra.mxu0 %v750_v55  ;;  %1051 = vmatmul.f32.vlgmr.msrb.gmra.mxu1 %v2477_v60 }
 0x185   : > { %1199 = vmatpush.xpose.msra.mxu0 %v2238_v12  ;;  %1256 = vmatpush.xpose.msra.mxu1 %v2256_v45 }
 0x186   : > { %1362 = vmatpush.xpose.msra.mxu3 %v2234_v7  ;;  %1092 = vmatmul.f32.vlgmr.msrb.gmra.mxu2 %v750_v55 }
 0x187   : > { %1301 = vmatpush.xpose.msra.mxu2 %v2677_v16 }
 0x188   : > { %1193 = vmatmul.f32.vlgmr.msrb.gmra.mxu3 %v2477_v60 }
 0x189   : > { %1202 = vmatpush.xpose.msra.mxu0 %v2252_v36  ;;  %1258 = vmatpush.xpose.msra.mxu1 %v2275_v2 }
 0x18a   : > { %1364 = vmatpush.xpose.msra.mxu3 %v2256_v45 }
 0x18b   : > { %1305 = vmatpush.xpose.msra.mxu2 %v1116_v62 }
 0x18c   : > { %1014 = vmatmul.f32.vlgmr.msrb.gmra.mxu0 %v2477_v60 }
 0x18d   : > { %1205 = vmatpush.xpose.msra.mxu0 %v2273_v63  ;;  %1260 = vmatpush.xpose.msra.mxu1 %v2291_v51 }
 0x18e   : > { %1366 = vmatpush.xpose.msra.mxu3 %v2275_v2 }
 0x18f   : > { %1309 = vmatpush.xpose.msra.mxu2 %v1122_v20 }
 0x191   : > { %1208 = vmatpush.xpose.msra.mxu0 %v2289_v48  ;;  %1262 = vmatpush.xpose.msra.mxu1 %v2306_v19 }
 0x192   : > { %1368 = vmatpush.xpose.msra.mxu3 %v2291_v51 }
 0x193   : > { %1313 = vmatpush.xpose.msra.mxu2 %v1128_v54 }
 0x195   : > { %1211 = vmatpush.xpose.msra.mxu0 %v2304_v40  ;;  %1264 = vmatpush.xpose.msra.mxu1 %v2312_v13 }
 0x196   : > { %1370 = vmatpush.xpose.msra.mxu3 %v2306_v19 }
 0x197   : > { %1317 = vmatpush.xpose.msra.mxu2 %v1134_v34 }
 0x199   : > { %1214 = vmatpush.xpose.msra.mxu0 %v2319_v22  ;;  %1266 = vmatpush.xpose.msra.mxu1 %v2332_v58  ;;  %v708_v22 = vld [vmem:[%s2637_s4] sm:$0x3] }
 0x19a   : > { %1372 = vmatpush.xpose.msra.mxu3 %v2312_v13  ;;  %v710_v40 = vperm.slane %v708_v22, 0  ;;  %v711_v63 = vperm.slane %v708_v22, 1 }
 0x19b   : > { %1321 = vmatpush.xpose.msra.mxu2 %v1140_v42 }
 0x19d   : > { %1217 = vmatpush.xpose.msra.mxu0 %v2325_v33  ;;  %1268 = vmatpush.xpose.msra.mxu1 %v2345_v11 }
 0x19e   : > { %1374 = vmatpush.xpose.msra.mxu3 %v2332_v58 }
 0x19f   : > { %1325 = vmatpush.xpose.msra.mxu2 %v1146_v47 }
 0x1a1   : > { %1220 = vmatpush.xpose.msra.mxu0 %v2343_v29  ;;  %1270 = vmatpush.xpose.msra.mxu1 %v2358_v27 }
 0x1a2   : > { %1376 = vmatpush.xpose.msra.mxu3 %v2345_v11 }
 0x1a3   : > { %1329 = vmatpush.xpose.msra.mxu2 %v1152_v1 }
 0x1a5   : > { %1223 = vmatpush.xpose.msra.mxu0 %v2356_v17  ;;  %1272 = vmatpush.xpose.msra.mxu1 %v2371_v30 }
 0x1a6   : > { %1378 = vmatpush.xpose.msra.mxu3 %v2358_v27 }
 0x1a7   : > { %1333 = vmatpush.xpose.msra.mxu2 %v1158_v37 }
 0x1a9   : > { %1226 = vmatpush.xpose.msra.mxu0 %v2369_v52  ;;  %1274 = vmatpush.xpose.msra.mxu1 %v2376_v59 }
 0x1aa   : > { %1380 = vmatpush.xpose.msra.mxu3 %v2371_v30 }
 0x1ab   : > { %1337 = vmatpush.xpose.msra.mxu2 %v1164_v8 }
 0x1ad   : > { %1229 = vmatpush.xpose.msra.mxu0 %v2384_v31  ;;  %1276 = vmatpush.xpose.msra.mxu1 %v2397_v38 }
 0x1ae   : > { %1382 = vmatpush.xpose.msra.mxu3 %v2376_v59 }
 0x1af   : > { %1341 = vmatpush.xpose.msra.mxu2 %v1170_v21 }
 0x1b1   : > { %1232 = vmatpush.xpose.msra.mxu0 %v2390_v0  ;;  %1278 = vmatpush.xpose.msra.mxu1 %v2410_v50 }
 0x1b2   : > { %1384 = vmatpush.xpose.msra.mxu3 %v2397_v38 }
 0x1b3   : > { %1345 = vmatpush.xpose.msra.mxu2 %v1176_v46 }
 0x1b5   : > { %1235 = vmatpush.xpose.msra.mxu0 %v2408_v26  ;;  %1280 = vmatpush.xpose.msra.mxu1 %v2423_v39 }
 0x1b6   : > { %1386 = vmatpush.xpose.msra.mxu3 %v2410_v50 }
 0x1b7   : > { %1349 = vmatpush.xpose.msra.mxu2 %v1182_v28 }
 0x1b9   : > { %1238 = vmatpush.xpose.msra.mxu0 %v2421_v56  ;;  %1282 = vmatpush.xpose.msra.mxu1 %v2436_v49 }
 0x1ba   : > { %1388 = vmatpush.xpose.msra.mxu3 %v2423_v39 }
 0x1bb   : > { %1353 = vmatpush.xpose.msra.mxu2 %v1188_v9 }
 0x1bc   : > { %1286 = vmatmul.f32.vlgmr.msra.gmra.mxu1 %v2486_v57 }
 0x1bd   : > { %1241 = vmatpush.xpose.msra.mxu0 %v2434_v3 }
 0x1be   : > { %1390 = vmatpush.xpose.msra.mxu3 %v2436_v49  ;;  %1355 = vmatmul.f32.vlgmr.msra.gmra.mxu2 %v2477_v60 }
 0x1c1   : > { %1392 = vmatmul.f32.vlgmr.msra.gmra.mxu3 %v2477_v60  ;;  %1244 = vmatpush.xpose.msra.mxu0 %v2447_v14 }
 0x1c4   : > { %1247 = vmatmul.f32.vlgmr.msra.gmra.mxu0 %v2480_v24 }
 0x1f9   : > { %v853_v12 = vpop.f32.mrf.mxu1 }
 0x201   : > { %v752_v61 = vpop.f32.mrf.mxu0  ;;  %v907_v7 = vpop.f32.mrf.mxu2 }
 0x202   : > { %v753_v20 = vadd.f32 %v752_v61, %v710_v40  ;;  %v1052_v62 = vpop.f32.mrf.mxu1 }
 0x203   : > { %v946_v36 = vpop.f32.mrf.mxu3 }
 0x204   : > { %v854_v45 = vadd.f32 %v853_v12, %v753_v20 }
 0x206   : > { %v908_v51 = vadd.f32 %v907_v7, %v854_v45 }
 0x208   : > { %v947_v33 = vadd.f32 %v946_v36, %v908_v51 }
 0x209   : > { %v1015_v2 = vpop.f32.mrf.mxu0  ;;  %v1093_v48 = vpop.f32.mrf.mxu2 }
 0x20a   : > { %v1094_v19 = vadd.f32 %v1093_v48, %v711_v63  ;;  %v1016_v34 = vadd.f32 %v1015_v2, %v947_v33 }
 0x20b   : > { %v1194_v13 = vpop.f32.mrf.mxu3 }
 0x20c   : > { %v1195_v54 = vadd.f32 %v1194_v13, %v1094_v19  ;;  %v1053_v27 = vadd.f32 %v1052_v62, %v1016_v34 }
 0x20e   : > { %v1396_v1 = vmul.f32 %v1053_v27, %v1053_v27 }
 0x239   : > { %v1287_v11 = vpop.f32.mrf.mxu1 }
 0x241   : > { %v1248_v58 = vpop.f32.mrf.mxu0  ;;  %v1356_v17 = vpop.f32.mrf.mxu2 }
 0x242   : > { %v1249_v29 = vadd.f32 %v1248_v58, %v1195_v54 }
 0x244   : > { %v1288_v42 = vadd.f32 %v1287_v11, %v1249_v29  ;;  %v1393_v52 = vpop.f32.mrf.mxu3 }
 0x246   : > { %v1357_v47 = vadd.f32 %v1356_v17, %v1288_v42 }
 0x248   : > { %v1394_v30 = vadd.f32 %v1393_v52, %v1357_v47 }
 0x24a   : > { %v1397_v59 = vmul.f32 %v1394_v30, %v1394_v30 }
 0x24c   : > { %v1398_v31 = vadd.f32 %v1397_v59, %v1396_v1 }
 0x24e   : > { %1399 = vadd.xlane.f32.xlu0 %v1398_v31 }
 0x2c1   : > { %v1400_v0 = vpop.xlane.xlu0 %1399 }
 0x2c2   : > { %v1401_v37 = vmax.f32 %v1400_v0, 1e-24 }
 0x2c4   : > { %1713 = vrsqrt.f32 %v1401_v37  ;;  %vm1408_vm12 = vweird.f32 %v1401_v37 }
 0x2ca   : > { %v1714_v38 = vpop.eup %1713 }
 0x2cb   : > { %v1403_v8 = vmul.f32 %v1714_v38, %v1401_v37  ;;  %vm1409_vm11 = vweird.f32 %v1714_v38 }
 0x2cc   : > { %vm1410_vm13 = vmor %vm1408_vm12, %vm1409_vm11 }
 0x2cd   : > { %v1404_v26 = vmul.f32 %v1714_v38, %v1403_v8 }
 0x2cf   : > { %v1405_v50 = vmul.f32 0.5, %v1404_v26 }
 0x2d1   : > { %v1406_v21 = vsub.f32 1.5, %v1405_v50 }
 0x2d3   : > { %v1407_v56 = vmul.f32 %v1714_v38, %v1406_v21 }
 0x2d5   : > { %v1411_v39 = vsel %vm1410_vm13, %v1714_v38, %v1407_v56 }
 0x2d6   : > { %v1412_v46 = vmul.f32 %v1411_v39, %v1053_v27  ;;  %v1413_v3 = vmul.f32 %v1411_v39, %v1394_v30 }
 0x2d8   : > { %1414 = vst [vmem:[%s2043_s10] sm:$0xff] %v1412_v46 }
 0x2d9   : > { %1415 = vst [vmem:[%s2043_s10 + $0x8] sm:$0xff] %v1413_v3 }
 0x2da PF: > { %s1583_s28 = sshll.u32 %s1847_s24, 4  ;;  %s1430_s12 = sshll.u32 %s2043_s10, 4  ;;  %s1431_s12 = int_to_ptr.vmem [resolvable:$true] %s1430_s12 }
 0x2db   : > { %s1428_s9 = scalar_lea.hbm %s2638_s5, %s1583_s28  ;;  %s1417_s6 = scalar_lea.sflag [#allocation7], %s434_s3 }
 0x2dc   : > { %s1432_s7 = sshll.u32 %s1428_s9, 4  ;;  %s1765_s24 = scalar_lea.hbm %s2638_s5, 32  ;;  %s1433_s7 = int_to_ptr.hbm [resolvable:$true] %s1432_s7 }
 0x2dd   : > { %s1759_s29 = sshra.s32 %s1433_s7, 4  ;;  %s1760_s29 = int_to_ptr.hbm [resolvable:$true] %s1759_s29 }
 0x2de   : > { %s1761_s30 = scalar_lea.hbm %s1760_s29, 16  ;;  %p1766_p0 = scmp.lt.s32.totalorder %s1760_s29, %s2638_s5 }
 0x2df   : > { %p1762_p10 = scmp.ne.s32.totalorder %s1760_s29, %s1761_s30  ;;  %p1767_p1 = scmp.lt.s32.totalorder %s1765_s24, %s1761_s30 }
 0x2e1   : > { %p1763_p11 = pnand %p1762_p10, %p1970_p7  ;;  %p1768_p2 = por %p1767_p1, %p1766_p0 }
 0x2e3   : > { %p1764_p13 = pneg %p1763_p11 }
 0x2e5   : > { %p1769_p4 = pnand %p1768_p2, %p1764_p13 }
 0x2e7   : > { %1772 = shalt.err (!%p1769_p4)
}
 0x2e8   : > { %1607 = dma.vmem_to_hbm [thread:$0]  (%p1970_p7), %s1431_s12, 256, %s1433_s7, %s1417_s6  }
 0x2e9 PF: > { %p1619_p5 = scmp.ge.s32.totalorder %s1859_s27, 2  ;;  %s1444_s3 = sand.u32 1, %s1823_s18  }
 0x2ea   : > { %s1445_s10 = scalar_lea.sflag [#allocation7], %s1444_s3 }
 0x2eb   : > { %p1614_p6 = pnand %p1619_p5, %p1978_p12 }
 0x2ed   : > { %p1615_p3 = pneg %p1614_p6 }
 0x2ef   : > { %1818 = dma.done.wait (%p1615_p3), %s1445_s10, 256  }
 0x2f0   : > { %1820 = vsyncadd (%p1615_p3), %s1445_s10, 4294967040  ;;  %s19_s27 = sadd.s32 1, %s1859_s27   ;;  %s2678_s23 = sld [smem:[#allocation11_spill]] }
 0x2f1   : > { %p16_p8 = scmp.ge.s32.totalorder %s19_s27, 6   ;;  %s2679_s20 = sld [smem:[#allocation14_spill]] }
 0x2f2   : > { %s2680_s11 = sld [smem:[#allocation15_spill]]  ;;  %s2683_s18 = smov %s1827_s19 }
 0x2f3   : > { %s2681_s17 = sld [smem:[#allocation12_spill]]  ;;  %s2685_s21 = smov %s1839_s22 }
 0x2f4   : > { %s2682_s28 = sld [smem:[#allocation13_spill]]  ;;  %s2688_s24 = smov %s1855_s26 }
 0x2f6   : > { %s2684_s19 = smov %s2678_s23  ;;  %s2687_s23 = smov %s1851_s25 }
 0x2f7   :  { %18 = sbr.rel (!%p16_p8) target bundleno = 9 (0x9), region = 186 }
 0x2f8   : > { %s2686_s22 = smov %s2680_s11 }
 0x2f9   : > { %s2689_s25 = smov %s2681_s17 }
 0x2fa   : > { %s2690_s26 = smov %s2682_s28 }
 0x2fc   :  { %1451 = vsyncpa [#allocation6], 1 }
 0x2fd   :  { %1453 = vsyncpa [#allocation6 + $0x1], 1 }
 0x2fe   :  { %1454 = vsyncpa [#allocation7], 1 }
 0x2ff   :  { %1456 = vsyncpa [#allocation7 + $0x1], 1 }

</bundles_post_ra>
